<compile_context>
chip_gen: v7x
topology: tpu7x:2x2x1
jax: 0.10.0
libtpu: 0.0.40
codegen_flags: <defaults>
</compile_context>

<pallas_src>
import jax
import jax.numpy as jnp
from jax.experimental import pallas as pl
from jax.experimental.pallas import tpu as pltpu

LANE = 128  # vreg lane width / MXU-friendly feature granularity


def _round_up(n, m):
    return ((n + m - 1) // m) * m


def mlp_kernel(x_ref, w1_ref, b1_ref, w2_ref, b2_ref, w3_ref, b3_ref, o_ref):
    # One batch tile per grid step: 3 MXU matmuls + EUP tanh, all in VMEM.
    x = x_ref[...]
    h1 = jnp.tanh(
        jnp.dot(x, w1_ref[...], preferred_element_type=jnp.float32) + b1_ref[...]
    )
    h2 = jnp.tanh(
        jnp.dot(h1, w2_ref[...], preferred_element_type=jnp.float32) + b2_ref[...]
    )
    out = jnp.dot(h2, w3_ref[...], preferred_element_type=jnp.float32) + b3_ref[...]
    o_ref[...] = out.astype(o_ref.dtype)


def mlp_forward(x, w1, b1, w2, b2, w3, b3, *, tb=None, mxu_dtype=None):
    """x: [batch, input_dim]; w*: [in, out]; b*: [1, out] (transposed vs. nn.Linear)."""
    batch, input_dim = x.shape
    hidden_dim = w1.shape[1]
    output_dim = w3.shape[1]

    # Lane-dense padded feature dims.
    d_in = _round_up(input_dim, LANE)
    d_h = _round_up(hidden_dim, LANE)
    d_out = _round_up(output_dim, LANE)

    # Batch tile: big enough to amortize per-step overhead, multiple of 8 sublanes.
    if tb is None:
        tb = min(256, _round_up(batch, 8))
    tb = max(8, _round_up(tb, 8))
    batch_p = _round_up(batch, tb)

    def pad2(a, rows, cols):
        return jnp.pad(a, ((0, rows - a.shape[0]), (0, cols - a.shape[1])))

    xp = pad2(x, batch_p, d_in)
    w1p, b1p = pad2(w1, d_in, d_h), pad2(b1, 1, d_h)
    w2p, b2p = pad2(w2, d_h, d_h), pad2(b2, 1, d_h)
    w3p, b3p = pad2(w3, d_h, d_out), pad2(b3, 1, d_out)

    if mxu_dtype is not None:
        # bf16 MXU inputs (v6e/v7x); accumulation / biases / tanh stay f32.
        xp = xp.astype(mxu_dtype)
        w1p = w1p.astype(mxu_dtype)
        w2p = w2p.astype(mxu_dtype)
        w3p = w3p.astype(mxu_dtype)

    grid = (batch_p // tb,)

    def pinned(shape):
        # Weights/biases: same block every grid step -> stay resident in VMEM.
        return pl.BlockSpec(shape, lambda i: (0, 0))

    out_padded = pl.pallas_call(
        mlp_kernel,
        out_shape=jax.ShapeDtypeStruct((batch_p, d_out), jnp.float32),
        grid=grid,
        in_specs=[
            pl.BlockSpec((tb, d_in), lambda i: (i, 0)),   # x: tiled over batch
            pinned(w1p.shape), pinned(b1p.shape),
            pinned(w2p.shape), pinned(b2p.shape),
            pinned(w3p.shape), pinned(b3p.shape),
        ],
        out_specs=pl.BlockSpec((tb, d_out), lambda i: (i, 0)),
        compiler_params=pltpu.CompilerParams(
            dimension_semantics=("parallel",),   # shard batch tiles across TCs on v7x
        ),
    )(xp, w1p, b1p, w2p, b2p, w3p, b3p)

    return out_padded[:batch, :output_dim]


def init_params(key, input_dim, hidden_dim, output_dim):
    # Deterministic, PyTorch-Linear-style uniform(-1/sqrt(fan_in), 1/sqrt(fan_in)) init.
    ks = jax.random.split(key, 6)

    def linear(kw, kb, fan_in, fan_out):
        bound = 1.0 / jnp.sqrt(float(fan_in))
        w = jax.random.uniform(kw, (fan_in, fan_out), jnp.float32, -bound, bound)
        b = jax.random.uniform(kb, (1, fan_out), jnp.float32, -bound, bound)
        return w, b

    w1, b1 = linear(ks[0], ks[1], input_dim, hidden_dim)
    w2, b2 = linear(ks[2], ks[3], hidden_dim, hidden_dim)
    w3, b3 = linear(ks[4], ks[5], hidden_dim, output_dim)
    return w1, b1, w2, b2, w3, b3


if __name__ == "__main__":
    # Small shapes consistent with the module's forward: x is [batch, input_dim].
    batch, input_dim, hidden_dim, output_dim = 16, 16, 32, 8

    key = jax.random.PRNGKey(0)
    k_x, k_p = jax.random.split(key)
    x = jax.random.normal(k_x, (batch, input_dim), dtype=jnp.float32)
    params = init_params(k_p, input_dim, hidden_dim, output_dim)
    w1, b1, w2, b2, w3, b3 = params

    # Pure-JAX reference.
    ref = jnp.tanh(x @ w1 + b1)
    ref = jnp.tanh(ref @ w2 + b2)
    ref = ref @ w3 + b3

    # Default tiling (single batch tile at this size).
    out = jax.block_until_ready(mlp_forward(x, *params))
    assert out.shape == (batch, output_dim)
    assert jnp.allclose(out, ref, atol=1e-5, rtol=1e-5)

    # Exercise the multi-step batch grid (tb=8 -> grid=(2,), pinned weights).
    out_gridded = jax.block_until_ready(mlp_forward(x, *params, tb=8))
    assert jnp.allclose(out_gridded, ref, atol=1e-5, rtol=1e-5)

    print("KERNEL_OK")
</pallas_src>

<mosaic_0001>
module attributes {stable_mosaic.version = 11 : i64} {
  func.func @mlp_kernel(%arg0: i32, %arg1: memref<16x128xf32, #tpu.memory_space<vmem>>, %arg2: memref<128x128xf32, #tpu.memory_space<vmem>>, %arg3: memref<1x128xf32, #tpu.memory_space<vmem>>, %arg4: memref<128x128xf32, #tpu.memory_space<vmem>>, %arg5: memref<1x128xf32, #tpu.memory_space<vmem>>, %arg6: memref<128x128xf32, #tpu.memory_space<vmem>>, %arg7: memref<1x128xf32, #tpu.memory_space<vmem>>, %arg8: memref<16x128xf32, #tpu.memory_space<vmem>>) attributes {dimension_semantics = [#tpu.dimension_semantics<parallel>], iteration_bounds = array<i64: 1>, scalar_prefetch = 0 : i64, scratch_operands = 0 : i64, tpu.core_type = #tpu.core_type<tc>, window_params = [{transform_indices = @transform_0, window_bounds = array<i64: 16, 128>}, {pipeline_mode = #tpu.pipeline_mode<synchronous>, transform_indices = @transform_1, window_bounds = array<i64: 128, 128>}, {pipeline_mode = #tpu.pipeline_mode<synchronous>, transform_indices = @transform_2, window_bounds = array<i64: 1, 128>}, {pipeline_mode = #tpu.pipeline_mode<synchronous>, transform_indices = @transform_3, window_bounds = array<i64: 128, 128>}, {pipeline_mode = #tpu.pipeline_mode<synchronous>, transform_indices = @transform_4, window_bounds = array<i64: 1, 128>}, {pipeline_mode = #tpu.pipeline_mode<synchronous>, transform_indices = @transform_5, window_bounds = array<i64: 128, 128>}, {pipeline_mode = #tpu.pipeline_mode<synchronous>, transform_indices = @transform_6, window_bounds = array<i64: 1, 128>}, {transform_indices = @transform_7, window_bounds = array<i64: 16, 128>}]} {
    %c0 = arith.constant 0 : index
    %c0_0 = arith.constant 0 : index
    %0 = vector.load %arg1[%c0, %c0_0] : memref<16x128xf32, #tpu.memory_space<vmem>>, vector<16x128xf32>
    %c0_1 = arith.constant 0 : index
    %c0_2 = arith.constant 0 : index
    %1 = vector.load %arg2[%c0_1, %c0_2] : memref<128x128xf32, #tpu.memory_space<vmem>>, vector<128x128xf32>
    %cst = arith.constant dense<0.000000e+00> : vector<16x128xf32>
    %2 = tpu.matmul %0, %1, %cst {dimension_numbers = #tpu.dot_dimension_numbers<[1], [0], [0], [1], [0, 0, 1, 1], [], []>} : vector<16x128xf32>, vector<128x128xf32>, vector<16x128xf32> -> vector<16x128xf32>
    %c0_3 = arith.constant 0 : index
    %c0_4 = arith.constant 0 : index
    %3 = vector.load %arg3[%c0_3, %c0_4] : memref<1x128xf32, #tpu.memory_space<vmem>>, vector<1x128xf32>
    %4 = vector.broadcast %3 : vector<1x128xf32> to vector<16x128xf32>
    %5 = arith.addf %2, %4 : vector<16x128xf32>
    %6 = math.tanh %5 : vector<16x128xf32>
    %c0_5 = arith.constant 0 : index
    %c0_6 = arith.constant 0 : index
    %7 = vector.load %arg4[%c0_5, %c0_6] : memref<128x128xf32, #tpu.memory_space<vmem>>, vector<128x128xf32>
    %cst_7 = arith.constant dense<0.000000e+00> : vector<16x128xf32>
    %8 = tpu.matmul %6, %7, %cst_7 {dimension_numbers = #tpu.dot_dimension_numbers<[1], [0], [0], [1], [0, 0, 1, 1], [], []>} : vector<16x128xf32>, vector<128x128xf32>, vector<16x128xf32> -> vector<16x128xf32>
    %c0_8 = arith.constant 0 : index
    %c0_9 = arith.constant 0 : index
    %9 = vector.load %arg5[%c0_8, %c0_9] : memref<1x128xf32, #tpu.memory_space<vmem>>, vector<1x128xf32>
    %10 = vector.broadcast %9 : vector<1x128xf32> to vector<16x128xf32>
    %11 = arith.addf %8, %10 : vector<16x128xf32>
    %12 = math.tanh %11 : vector<16x128xf32>
    %c0_10 = arith.constant 0 : index
    %c0_11 = arith.constant 0 : index
    %13 = vector.load %arg6[%c0_10, %c0_11] : memref<128x128xf32, #tpu.memory_space<vmem>>, vector<128x128xf32>
    %cst_12 = arith.constant dense<0.000000e+00> : vector<16x128xf32>
    %14 = tpu.matmul %12, %13, %cst_12 {dimension_numbers = #tpu.dot_dimension_numbers<[1], [0], [0], [1], [0, 0, 1, 1], [], []>} : vector<16x128xf32>, vector<128x128xf32>, vector<16x128xf32> -> vector<16x128xf32>
    %c0_13 = arith.constant 0 : index
    %c0_14 = arith.constant 0 : index
    %15 = vector.load %arg7[%c0_13, %c0_14] : memref<1x128xf32, #tpu.memory_space<vmem>>, vector<1x128xf32>
    %16 = vector.broadcast %15 : vector<1x128xf32> to vector<16x128xf32>
    %17 = arith.addf %14, %16 : vector<16x128xf32>
    %c0_15 = arith.constant 0 : index
    %c0_16 = arith.constant 0 : index
    %18 = vector.load %arg8[%c0_15, %c0_16] : memref<16x128xf32, #tpu.memory_space<vmem>>, vector<16x128xf32>
    tpu.vector_store %arg8[%c0_15, %c0_16], %17 {strides = array<i32>} : memref<16x128xf32, #tpu.memory_space<vmem>>, vector<16x128xf32>,
    return
  }
  func.func @transform_0(%arg0: i32) -> (i32, i32) {
    %c0_i32 = arith.constant 0 : i32
    %c0_i32_0 = arith.constant 0 : i32
    return %arg0, %c0_i32 : i32, i32
  }
  func.func @transform_1(%arg0: i32) -> (i32, i32) {
    %c0_i32 = arith.constant 0 : i32
    %c0_i32_0 = arith.constant 0 : i32
    %c0_i32_1 = arith.constant 0 : i32
    return %c0_i32, %c0_i32_0 : i32, i32
  }
  func.func @transform_2(%arg0: i32) -> (i32, i32) {
    %c0_i32 = arith.constant 0 : i32
    %c0_i32_0 = arith.constant 0 : i32
    %c0_i32_1 = arith.constant 0 : i32
    return %c0_i32, %c0_i32_0 : i32, i32
  }
  func.func @transform_3(%arg0: i32) -> (i32, i32) {
    %c0_i32 = arith.constant 0 : i32
    %c0_i32_0 = arith.constant 0 : i32
    %c0_i32_1 = arith.constant 0 : i32
    return %c0_i32, %c0_i32_0 : i32, i32
  }
  func.func @transform_4(%arg0: i32) -> (i32, i32) {
    %c0_i32 = arith.constant 0 : i32
    %c0_i32_0 = arith.constant 0 : i32
    %c0_i32_1 = arith.constant 0 : i32
    return %c0_i32, %c0_i32_0 : i32, i32
  }
  func.func @transform_5(%arg0: i32) -> (i32, i32) {
    %c0_i32 = arith.constant 0 : i32
    %c0_i32_0 = arith.constant 0 : i32
    %c0_i32_1 = arith.constant 0 : i32
    return %c0_i32, %c0_i32_0 : i32, i32
  }
  func.func @transform_6(%arg0: i32) -> (i32, i32) {
    %c0_i32 = arith.constant 0 : i32
    %c0_i32_0 = arith.constant 0 : i32
    %c0_i32_1 = arith.constant 0 : i32
    return %c0_i32, %c0_i32_0 : i32, i32
  }
  func.func @transform_7(%arg0: i32) -> (i32, i32) {
    %c0_i32 = arith.constant 0 : i32
    %c0_i32_0 = arith.constant 0 : i32
    return %arg0, %c0_i32 : i32, i32
  }
}

</mosaic_0001>

<bundles_post_ra>
// kernel: tpu_custom_call.1
= control target key start
LH: loop header
LB: loop body
LE: loop exit
PB: predicated region body
PF: predicated region fallthrough
CT: control target
= control target key end

     0   :  { %12 = vsyncpa [#allocation3], 0  ;;  %s939_s0 = inlined_call_operand.hbm [shape: f32[16,128], index: 0, kind: input, shape index: {}]   ;;  %s940_s1 = inlined_call_operand.hbm [shape: f32[128,128], index: 1, kind: input, shape index: {}]   ;;  %s941_s2 = inlined_call_operand.vmem [shape: f32[1,128], index: 2, kind: input, shape index: {}]   ;;  %s942_s3 = inlined_call_operand.hbm [shape: f32[128,128], index: 3, kind: input, shape index: {}]   ;;  %s943_s4 = inlined_call_operand.vmem [shape: f32[1,128], index: 4, kind: input, shape index: {}]   ;;  %s944_s5 = inlined_call_operand.hbm [shape: f32[128,128], index: 5, kind: input, shape index: {}]   ;;  %s945_s6 = inlined_call_operand.vmem [shape: f32[1,128], index: 6, kind: input, shape index: {}]   ;;  %s946_s7 = inlined_call_operand.hbm [shape: f32[16,128], index: 7, kind: output, shape index: {}]  }
   0x1   :  { %13 = vsyncpa [#allocation6], 0 }
   0x2   :  { %14 = vsyncpa [#allocation9], 0 }
   0x3   :  { %15 = vsyncpa [#allocation4], 0  ;;  %s794_s24 = smov [#allocation5]   ;;  %s795_s26 = smov [#allocation2]  }
   0x4   :  { %s33_s25 = sshll.u32 %s794_s24, 4  ;;  %s21_s27 = sshll.u32 %s795_s26, 4  ;;  %s34_s25 = int_to_ptr.vmem [resolvable:$true] %s33_s25  ;;  %s841_s27 = int_to_ptr.vmem [resolvable:$true] %s21_s27 }
   0x5   :  { %s676_s30 = scalar_lea.hbm %s940_s1, 2048 }
   0x6   :  { %p677_p0 = scmp.ne.s32.totalorder %s940_s1, %s676_s30  ;;  %p680_p1 = scmp.lt.u32.totalorder %s676_s30, %s940_s1 }
   0x8   :  { %p682_p2 = pnand %p680_p1, %p677_p0 }
   0xa   :  { %685 = shalt.err (!%p682_p2)
}
   0xb   :  { %s686_s12 = scalar_lea.vmem %s34_s25, 2048  ;;  %p691_p4 = scmp.lt.s32.totalorder %s34_s25, %s34_s25 }
   0xc   :  { %p687_p3 = scmp.ne.s32.totalorder %s34_s25, %s686_s12  ;;  %p692_p5 = scmp.lt.s32.totalorder %s686_s12, %s686_s12 }
   0xe   :  { %p693_p6 = por %p692_p5, %p691_p4 }
  0x10   :  { %p694_p7 = pnand %p693_p6, %p687_p3 }
  0x12   :  { %697 = shalt.err (!%p694_p7)
}
  0x13   :  { %s796_s13 = smov 128   ;;  %s797_s14 = smov 8  }
  0x14   :  { %39 = dma.hbm_to_vmem [thread:$0]  %s940_s1, 2048, %s34_s25, [#allocation6], %s796_s13, %s796_s13, %s797_s14  }
  0x15   :  { %s698_s19 = scalar_lea.hbm %s939_s0, 256 }
  0x16   :  { %p699_p8 = scmp.ne.s32.totalorder %s939_s0, %s698_s19  ;;  %p702_p9 = scmp.lt.u32.totalorder %s698_s19, %s939_s0 }
  0x18   :  { %p704_p10 = pnand %p702_p9, %p699_p8 }
  0x1a   :  { %707 = shalt.err (!%p704_p10)
}
  0x1b   :  { %s708_s24 = scalar_lea.vmem %s841_s27, 256  ;;  %p713_p12 = scmp.lt.s32.totalorder %s841_s27, %s841_s27 }
  0x1c   :  { %p709_p11 = scmp.ne.s32.totalorder %s841_s27, %s708_s24  ;;  %p714_p13 = scmp.lt.s32.totalorder %s708_s24, %s708_s24 }
  0x1e   :  { %p715_p0 = por %p714_p13, %p713_p12 }
  0x20   :  { %p716_p1 = pnand %p715_p0, %p709_p11 }
  0x22   :  { %719 = shalt.err (!%p716_p1)
}
  0x23   :  { %27 = dma.hbm_to_vmem [thread:$0]  %s939_s0, 256, %s841_s27, [#allocation3], %s796_s13, %s796_s13, %s797_s14  }
  0x24   :  { %s798_s26 = smov [#allocation7]   ;;  %s799_s29 = smov [#allocation8]  }
  0x25   :  { %s47_s28 = sshll.u32 %s798_s26, 4  ;;  %s61_s30 = sshll.u32 %s799_s29, 4  ;;  %s48_s28 = int_to_ptr.vmem [resolvable:$true] %s47_s28  ;;  %s878_s30 = int_to_ptr.vmem [resolvable:$true] %s61_s30 }
  0x26   :  { %s720_s10 = scalar_lea.hbm %s942_s3, 2048 }
  0x27   :  { %p721_p2 = scmp.ne.s32.totalorder %s942_s3, %s720_s10  ;;  %p724_p3 = scmp.lt.u32.totalorder %s720_s10, %s942_s3 }
  0x29   :  { %p726_p4 = pnand %p724_p3, %p721_p2 }
  0x2b   :  { %729 = shalt.err (!%p726_p4)
}
  0x2c   :  { %s730_s0 = scalar_lea.vmem %s48_s28, 2048  ;;  %p735_p6 = scmp.lt.s32.totalorder %s48_s28, %s48_s28 }
  0x2d   :  { %p731_p5 = scmp.ne.s32.totalorder %s48_s28, %s730_s0  ;;  %p736_p7 = scmp.lt.s32.totalorder %s730_s0, %s730_s0 }
  0x2f   :  { %p737_p8 = por %p736_p7, %p735_p6 }
  0x31   :  { %p738_p9 = pnand %p737_p8, %p731_p5 }
  0x33   :  { %741 = shalt.err (!%p738_p9)
}
  0x34   :  { %53 = dma.hbm_to_vmem [thread:$0]  %s942_s3, 2048, %s48_s28, [#allocation6], %s796_s13, %s796_s13, %s797_s14  }
  0x35   :  { %s742_s20 = scalar_lea.hbm %s944_s5, 2048 }
  0x36   :  { %p743_p10 = scmp.ne.s32.totalorder %s944_s5, %s742_s20  ;;  %p746_p11 = scmp.lt.u32.totalorder %s742_s20, %s944_s5 }
  0x38   :  { %p748_p12 = pnand %p746_p11, %p743_p10 }
  0x3a   :  { %751 = shalt.err (!%p748_p12)
}
  0x3b   :  { %s752_s1 = scalar_lea.vmem %s878_s30, 2048  ;;  %p757_p0 = scmp.lt.s32.totalorder %s878_s30, %s878_s30 }
  0x3c   :  { %p753_p13 = scmp.ne.s32.totalorder %s878_s30, %s752_s1  ;;  %p758_p1 = scmp.lt.s32.totalorder %s752_s1, %s752_s1 }
  0x3e   :  { %p759_p2 = por %p758_p1, %p757_p0 }
  0x40   :  { %p760_p3 = pnand %p759_p2, %p753_p13 }
  0x42   :  { %763 = shalt.err (!%p760_p3)
}
  0x43   :  { %67 = dma.hbm_to_vmem [thread:$0]  %s944_s5, 2048, %s878_s30, [#allocation9], %s796_s13, %s796_s13, %s797_s14  }
  0x44   :  { %786 = dma.done.wait [#allocation3], 256  }
  0x45   :  { %787 = vsyncadd [#allocation3], 4294967040 }
  0x46   :  { %788 = dma.done.wait [#allocation6], 4096  }
  0x47   :  { %789 = vsyncadd [#allocation6], 4294963200 }
  0x48   :  { %790 = dma.done.wait [#allocation9], 2048  }
  0x49   :  { %791 = vsyncadd [#allocation9], 4294965248  ;;  %v84_v0 = vld [vmem:[#allocation5] sm:$0xff]  ;;  %v85_v1 = vld [vmem:[#allocation5 + $0x8] sm:$0xff]  ;;  %s800_s8 = smov [#allocation10]  }
  0x4a   :  { %v86_v2 = vld [vmem:[#allocation5 + $0x10] sm:$0xff]  ;;  %v565_v3 = vpack.c.bf16 %v85_v1, %v84_v0  ;;  %v87_v4 = vld [vmem:[#allocation5 + $0x18] sm:$0xff]  ;;  %v88_v6 = vld [vmem:[#allocation5 + $0x20] sm:$0xff]  ;;  %s389_s9 = sshll.u32 %s800_s8, 4  ;;  %s390_s9 = int_to_ptr.vmem [resolvable:$true] %s389_s9 }
  0x4b   :  { %v569_v5 = vpack.c.bf16 %v87_v4, %v86_v2  ;;  %v89_v7 = vld [vmem:[#allocation5 + $0x28] sm:$0xff]  ;;  %v90_v9 = vld [vmem:[#allocation5 + $0x30] sm:$0xff]  ;;  %v91_v10 = vld [vmem:[#allocation5 + $0x38] sm:$0xff]  ;;  %p769_p5 = scmp.lt.s32.totalorder %s390_s9, %s390_s9 }
  0x4c   :  { %566 = vmatprep.subr.bf16.mxu0 %v565_v3  ;;  %v573_v8 = vpack.c.bf16 %v89_v7, %v88_v6  ;;  %v82_v11 = vld [vmem:[#allocation2] sm:$0xff]  ;;  %v184_v12 = vld [vmem:[#allocation7] sm:$0xff]  ;;  %v185_v13 = vld [vmem:[#allocation7 + $0x8] sm:$0xff]  ;;  %v577_v20 = vpack.c.bf16 %v91_v10, %v90_v9 }
  0x4d   :  { %568 = vmatpush3.bf16.msra.mxu0 %v565_v3  ;;  %492 = vmatprep.mubr.f32.mxu0 %v82_v11  ;;  %v186_v14 = vld [vmem:[#allocation7 + $0x10] sm:$0xff]  ;;  %v597_v15 = vpack.c.bf16 %v185_v13, %v184_v12  ;;  %v187_v16 = vld [vmem:[#allocation7 + $0x18] sm:$0xff]  ;;  %v188_v18 = vld [vmem:[#allocation7 + $0x20] sm:$0xff] }
  0x4e   :  { %570 = vmatprep.subr.bf16.mxu0 %v569_v5  ;;  %v601_v17 = vpack.c.bf16 %v187_v16, %v186_v14  ;;  %v189_v19 = vld [vmem:[#allocation7 + $0x28] sm:$0xff]  ;;  %v92_v21 = vld [vmem:[#allocation5 + $0x40] sm:$0xff]  ;;  %v190_v24 = vld [vmem:[#allocation7 + $0x30] sm:$0xff] }
  0x4f   :  { %598 = vmatprep.subr.bf16.mxu1 %v597_v15  ;;  %v93_v22 = vld [vmem:[#allocation5 + $0x48] sm:$0xff]  ;;  %v605_v23 = vpack.c.bf16 %v189_v19, %v188_v18  ;;  %v191_v25 = vld [vmem:[#allocation7 + $0x38] sm:$0xff]  ;;  %v94_v27 = vld [vmem:[#allocation5 + $0x50] sm:$0xff] }
  0x50   :  { %600 = vmatpush3.bf16.msra.mxu1 %v597_v15  ;;  %v581_v26 = vpack.c.bf16 %v93_v22, %v92_v21  ;;  %v95_v28 = vld [vmem:[#allocation5 + $0x58] sm:$0xff]  ;;  %v609_v29 = vpack.c.bf16 %v191_v25, %v190_v24  ;;  %v96_v31 = vld [vmem:[#allocation5 + $0x60] sm:$0xff]  ;;  %v97_v32 = vld [vmem:[#allocation5 + $0x68] sm:$0xff] }
  0x51   :  { %572 = vmatpush3.bf16.msra.mxu0 %v569_v5  ;;  %602 = vmatprep.subr.bf16.mxu1 %v601_v17  ;;  %v585_v30 = vpack.c.bf16 %v95_v28, %v94_v27  ;;  %v589_v33 = vpack.c.bf16 %v97_v32, %v96_v31  ;;  %v98_v34 = vld [vmem:[#allocation5 + $0x70] sm:$0xff]  ;;  %v99_v35 = vld [vmem:[#allocation5 + $0x78] sm:$0xff]  ;;  %v192_v38 = vld [vmem:[#allocation7 + $0x40] sm:$0xff] }
  0x52   :  { %574 = vmatprep.subr.bf16.mxu0 %v573_v8  ;;  %v593_v36 = vpack.c.bf16 %v99_v35, %v98_v34  ;;  %v83_v37 = vld [vmem:[#allocation2 + $0x8] sm:$0xff]  ;;  %v193_v39 = vld [vmem:[#allocation7 + $0x48] sm:$0xff]  ;;  %v194_v41 = vld [vmem:[#allocation7 + $0x50] sm:$0xff] }
  0x53   :  { %v613_v40 = vpack.c.bf16 %v193_v39, %v192_v38  ;;  %v195_v42 = vld [vmem:[#allocation7 + $0x58] sm:$0xff]  ;;  %v196_v44 = vld [vmem:[#allocation7 + $0x60] sm:$0xff]  ;;  %v197_v45 = vld [vmem:[#allocation7 + $0x68] sm:$0xff] }
  0x54   :  { %604 = vmatpush3.bf16.msra.mxu1 %v601_v17  ;;  %v617_v43 = vpack.c.bf16 %v195_v42, %v194_v41  ;;  %v198_v46 = vld [vmem:[#allocation7 + $0x70] sm:$0xff]  ;;  %v621_v47 = vpack.c.bf16 %v197_v45, %v196_v44  ;;  %v199_v48 = vld [vmem:[#allocation7 + $0x78] sm:$0xff]  ;;  %v284_v50 = vld [vmem:[#allocation8] sm:$0xff] }
  0x55   :  { %576 = vmatpush3.bf16.msra.mxu0 %v573_v8  ;;  %606 = vmatprep.subr.bf16.mxu1 %v605_v23  ;;  %v625_v49 = vpack.c.bf16 %v199_v48, %v198_v46  ;;  %v285_v51 = vld [vmem:[#allocation8 + $0x8] sm:$0xff]  ;;  %v286_v52 = vld [vmem:[#allocation8 + $0x10] sm:$0xff]  ;;  %v287_v54 = vld [vmem:[#allocation8 + $0x18] sm:$0xff] }
  0x56   :  { %578 = vmatprep.subr.bf16.mxu0 %v577_v20  ;;  %v629_v53 = vpack.c.bf16 %v285_v51, %v284_v50  ;;  %v633_v55 = vpack.c.bf16 %v287_v54, %v286_v52  ;;  %v288_v56 = vld [vmem:[#allocation8 + $0x20] sm:$0xff]  ;;  %v289_v57 = vld [vmem:[#allocation8 + $0x28] sm:$0xff]  ;;  %v290_v59 = vld [vmem:[#allocation8 + $0x30] sm:$0xff] }
  0x57   :  { %v637_v58 = vpack.c.bf16 %v289_v57, %v288_v56  ;;  %v291_v60 = vld [vmem:[#allocation8 + $0x38] sm:$0xff]  ;;  %v403_v62 = vld [vmem:[%s941_s2] ss:$0 sm:$0xff]  ;;  %v292_v5 = vld [vmem:[#allocation8 + $0x40] sm:$0xff] }
  0x58   :  { %608 = vmatpush3.bf16.msra.mxu1 %v605_v23  ;;  %v641_v61 = vpack.c.bf16 %v291_v60, %v290_v59  ;;  %v293_v6 = vld [vmem:[#allocation8 + $0x48] sm:$0xff]  ;;  %v294_v8 = vld [vmem:[#allocation8 + $0x50] sm:$0xff]  ;;  %v295_v9 = vld [vmem:[#allocation8 + $0x58] sm:$0xff] }
  0x59   :  { %580 = vmatpush3.bf16.msra.mxu0 %v577_v20  ;;  %610 = vmatprep.subr.bf16.mxu1 %v609_v29  ;;  %v645_v7 = vpack.c.bf16 %v293_v6, %v292_v5  ;;  %v649_v10 = vpack.c.bf16 %v295_v9, %v294_v8  ;;  %v296_v11 = vld [vmem:[#allocation8 + $0x60] sm:$0xff]  ;;  %v297_v12 = vld [vmem:[#allocation8 + $0x68] sm:$0xff]  ;;  %v298_v13 = vld [vmem:[#allocation8 + $0x70] sm:$0xff] }
  0x5a   :  { %582 = vmatprep.subr.bf16.mxu0 %v581_v26  ;;  %v653_v14 = vpack.c.bf16 %v297_v12, %v296_v11  ;;  %v299_v15 = vld [vmem:[#allocation8 + $0x78] sm:$0xff]  ;;  %v404_v17 = vld [vmem:[%s943_s4] ss:$0 sm:$0xff]  ;;  %s764_s4 = scalar_lea.vmem %s390_s9, 256 }
  0x5b   :  { %v657_v16 = vpack.c.bf16 %v299_v15, %v298_v13  ;;  %v405_v24 = vld [vmem:[%s945_s6] ss:$0 sm:$0xff]  ;;  %p765_p4 = scmp.ne.s32.totalorder %s390_s9, %s764_s4  ;;  %p770_p6 = scmp.lt.s32.totalorder %s764_s4, %s764_s4 }
  0x5c   :  { %612 = vmatpush3.bf16.msra.mxu1 %v609_v29 }
  0x5d   :  { %584 = vmatpush3.bf16.msra.mxu0 %v581_v26  ;;  %614 = vmatprep.subr.bf16.mxu1 %v613_v40  ;;  %p771_p7 = por %p770_p6, %p769_p5 }
  0x5e   :  { %586 = vmatprep.subr.bf16.mxu0 %v585_v30 }
  0x5f   :  { %p772_p8 = pnand %p771_p7, %p765_p4 }
  0x60   :  { %616 = vmatpush3.bf16.msra.mxu1 %v613_v40 }
  0x61   :  { %588 = vmatpush3.bf16.msra.mxu0 %v585_v30  ;;  %618 = vmatprep.subr.bf16.mxu1 %v617_v43 }
  0x62   :  { %590 = vmatprep.subr.bf16.mxu0 %v589_v33 }
  0x64   :  { %620 = vmatpush3.bf16.msra.mxu1 %v617_v43 }
  0x65   :  { %592 = vmatpush3.bf16.msra.mxu0 %v589_v33  ;;  %622 = vmatprep.subr.bf16.mxu1 %v621_v47 }
  0x66   :  { %594 = vmatprep.subr.bf16.mxu0 %v593_v36 }
  0x68   :  { %624 = vmatpush3.bf16.msra.mxu1 %v621_v47 }
  0x69   :  { %596 = vmatpush3.bf16.msra.mxu0 %v593_v36  ;;  %626 = vmatprep.subr.bf16.mxu1 %v625_v49 }
  0x6a   :  { %630 = vmatprep.subr.bf16.mxu0 %v629_v53 }
  0x6c   :  { %493 = vmatmul.mubr.f32.vlgmr.msra.gmra.mrb[0].mxu0 %v83_v37  ;;  %628 = vmatpush3.bf16.msra.mxu1 %v625_v49 }
  0x6d   :  { %632 = vmatpush3.bf16.msra.mxu0 %v629_v53 }
  0x6e   :  { %634 = vmatprep.subr.bf16.mxu0 %v633_v55 }
  0x71   :  { %636 = vmatpush3.bf16.msra.mxu0 %v633_v55 }
  0x72   :  { %638 = vmatprep.subr.bf16.mxu0 %v637_v58 }
  0x75   :  { %640 = vmatpush3.bf16.msra.mxu0 %v637_v58 }
  0x76   :  { %642 = vmatprep.subr.bf16.mxu0 %v641_v61 }
  0x79   :  { %644 = vmatpush3.bf16.msra.mxu0 %v641_v61 }
  0x7a   :  { %646 = vmatprep.subr.bf16.mxu0 %v645_v7 }
  0x7d   :  { %648 = vmatpush3.bf16.msra.mxu0 %v645_v7 }
  0x7e   :  { %650 = vmatprep.subr.bf16.mxu0 %v649_v10 }
  0x81   :  { %652 = vmatpush3.bf16.msra.mxu0 %v649_v10 }
  0x82   :  { %654 = vmatprep.subr.bf16.mxu0 %v653_v14 }
  0x85   :  { %656 = vmatpush3.bf16.msra.mxu0 %v653_v14 }
  0x86   :  { %658 = vmatprep.subr.bf16.mxu0 %v657_v16 }
  0x89   :  { %660 = vmatpush3.bf16.msra.mxu0 %v657_v16 }
 0x13f   :  { %v494_v63 = vpop.f32.mrb[0].mxu0 }
 0x140   :  { %v179_v0 = vadd.f32 %v494_v63, %v403_v62  ;;  %v173_v1 = vpop.f32.mrb[1].mxu0 }
 0x141   :  { %v174_v2 = vadd.f32 %v403_v62, %v173_v1 }
 0x143   :  { %668 = vtanh.f32 %v174_v2 }
 0x144   :  { %670 = vtanh.f32 %v179_v0 }
 0x14d   :  { %v669_v3 = vpop.eup %668 }
 0x14e   :  { %v671_v4 = vpop.eup %670  ;;  %527 = vmatprep.mubr.f32.mxu1 %v669_v3 }
 0x14f   :  { %528 = vmatmul.mubr.f32.vlgmr.msra.gmra.mrb[0].mxu1 %v671_v4 }
 0x222   :  { %v529_v18 = vpop.f32.mrb[0].mxu1 }
 0x223   :  { %v279_v19 = vadd.f32 %v529_v18, %v404_v17  ;;  %v273_v20 = vpop.f32.mrb[1].mxu1 }
 0x224   :  { %v274_v21 = vadd.f32 %v404_v17, %v273_v20 }
 0x226   :  { %672 = vtanh.f32 %v274_v21 }
 0x227   :  { %674 = vtanh.f32 %v279_v19 }
 0x230   :  { %v673_v22 = vpop.eup %672 }
 0x231   :  { %v675_v23 = vpop.eup %674  ;;  %562 = vmatprep.mubr.f32.mxu0 %v673_v22 }
 0x232   :  { %563 = vmatmul.mubr.f32.vlgmr.msra.gmra.mrb[2].mxu0 %v675_v23 }
 0x305   :  { %v564_v25 = vpop.f32.mrb[2].mxu0 }
 0x306   :  { %v379_v26 = vadd.f32 %v564_v25, %v405_v24  ;;  %v373_v27 = vpop.f32.mrb[3].mxu0 }
 0x307   :  { %v374_v28 = vadd.f32 %v405_v24, %v373_v27 }
 0x308   :  { %383 = vst [vmem:[#allocation10 + $0x8] sm:$0xff] %v379_v26 }
 0x309   :  { %382 = vst [vmem:[#allocation10] sm:$0xff] %v374_v28 }
 0x30a   :  { %775 = shalt.err (!%p772_p8)
}
 0x30b   :  { %s776_s6 = scalar_lea.hbm %s946_s7, 256 }
 0x30c   :  { %p777_p9 = scmp.ne.s32.totalorder %s946_s7, %s776_s6  ;;  %p780_p10 = scmp.lt.u32.totalorder %s776_s6, %s946_s7 }
 0x30e   :  { %p782_p11 = pnand %p780_p10, %p777_p9 }
 0x310   :  { %785 = shalt.err (!%p782_p11)
}
 0x311   :  { %395 = dma.vmem_to_hbm [thread:$0]  %s390_s9, 256, %s946_s7, [#allocation4], %s796_s13, %s796_s13, %s797_s14  }
 0x312   :  { %792 = dma.done.wait [#allocation4], 256  }
 0x313   :  { %793 = vsyncadd [#allocation4], 4294967040 }
 0x314   :  { %399 = vsyncpa [#allocation3], 1 }
 0x315   :  { %400 = vsyncpa [#allocation6], 1 }
 0x316   :  { %401 = vsyncpa [#allocation9], 1 }
 0x317   :  { %402 = vsyncpa [#allocation4], 1 }

</bundles_post_ra>
